<compile_context>
chip_gen: v5e
topology: v5e:2x2
jax: 0.10.0
libtpu: 0.0.40
codegen_flags: <defaults>
</compile_context>

<pallas_src>
import math
import numpy as np
import jax
import jax.numpy as jnp
from jax.experimental import pallas as pl
from jax.experimental.pallas import tpu as pltpu

_LANE = 128
_SMALL_N = 1024            # below this, a plain XLA dot beats the Pallas dispatch
_MIN_GRID_STEPS = 4        # keep >= 4 grid steps for megacore sharding on v7x


def _build_invM_np(shape):
    """Same construction as _MK.__init__ (float64 inversion, on host)."""
    invMs = []
    for l in shape:
        M = np.zeros((l, l), dtype=np.float64)
        for i in range(l):
            M[i] = (np.arange(l) - (l - 1) // 2) ** i / math.factorial(i)
        invMs.append(np.linalg.inv(M))
    return invMs


def _build_kron_np(shape):
    """K = kron(invM0, invM1, ...) precomputed once on host (float64)."""
    invMs = _build_invM_np(shape)
    K = invMs[0]
    for A in invMs[1:]:
        K = np.kron(K, A)
    return K, invMs


def _round_up(x, m):
    return (x + m - 1) // m * m


def _pick_tn_max():
    """Per-generation row-tile upper bound (conservative default if unknown)."""
    kind = ""
    try:
        kind = jax.devices()[0].device_kind.lower()
    except Exception:
        pass
    if ("v5 lite" in kind) or ("v5e" in kind) or ("v5lite" in kind):
        return 4096            # v5e: ~820 GB/s HBM, 16 MiB default scoped VMEM
    if "v6" in kind:
        return 8192            # v6e: ~1.4 TB/s HBM, 32 MiB default scoped VMEM
    if ("v7" in kind) or ("7x" in kind):
        return 16384           # v7x: ~3.2 TB/s HBM; amortize ~0.35us/step overhead
    return 4096                # unknown chip: fits every default scoped VMEM


def _m2k_kernel(kt_ref, m_ref, o_ref):
    # out_tile[tn, P] = m_tile[tn, P] @ K^T[P, P]
    # Contraction depth P is tiny; the kernel is HBM-bound, MXU padding hides
    # under the DMA.  Upcast the m tile so the contraction runs in f32 even for
    # bf16 inputs (K^T is always f32).
    m = m_ref[...].astype(jnp.float32)
    o_ref[...] = jnp.dot(
        m, kt_ref[...], preferred_element_type=jnp.float32
    ).astype(o_ref.dtype)


def make_m2k(shape):
    """Returns forward(m) equivalent to M2K(shape).forward for m of shape [..., *shape]."""
    shape = tuple(int(s) for s in shape)
    nd = len(shape)
    P = int(np.prod(shape))
    K_np, _ = _build_kron_np(shape)
    # TODO(synk): PyTorch keeps invM buffers / contraction in float64; TPU path runs f32.
    KT_f32 = jnp.asarray(K_np.T, dtype=jnp.float32)   # K^T, contraction in f32 always

    tn_cap = _pick_tn_max()
    lanes = _round_up(P, _LANE)                        # lane padding of the (tn, P) tile
    tn_cap = max(512, _round_up(tn_cap * _LANE // lanes, 8))

    def forward(m):
        sizem = m.shape
        assert m.ndim >= nd and tuple(sizem[-nd:]) == shape
        lead = sizem[:-nd]
        N = int(np.prod(lead)) if lead else 1          # _packdim: flatten leading dims

        m_flat = m.reshape(N, P)                       # free view, no HBM relayout

        if N < _SMALL_N:
            # Tiny-N fast path: lane-padding + kernel dispatch would dominate.
            out = jnp.dot(
                m_flat.astype(jnp.float32), KT_f32,
                preferred_element_type=jnp.float32,
            ).astype(m.dtype)
            return out.reshape(sizem)

        # Row tile: per-generation cap, >= _MIN_GRID_STEPS grid steps, multiple of 8.
        tn = min(tn_cap, _round_up(-(-N // _MIN_GRID_STEPS), 8))
        grid = pl.cdiv(N, tn)                          # ragged last block is clipped
        n_pad = grid * tn

        itemsize = jnp.dtype(m.dtype).itemsize
        cost = pl.CostEstimate(
            flops=2 * n_pad * P * P,
            transcendentals=0,
            bytes_accessed=2 * n_pad * P * itemsize + P * P * 4,
        )

        # VMEM budget: 2 double-buffered (tn, P) streams, lane-padded to `lanes`.
        buf_bytes = tn * lanes * max(itemsize, 4)
        vmem_limit = 4 * buf_bytes + (8 << 20)

        out_flat = pl.pallas_call(
            _m2k_kernel,
            out_shape=jax.ShapeDtypeStruct((N, P), m.dtype),
            grid_spec=pl.GridSpec(
                grid=(grid,),
                in_specs=[
                    pl.BlockSpec((P, P), lambda i: (0, 0)),    # K^T resident across grid
                    pl.BlockSpec((tn, P), lambda i: (i, 0)),   # stream contiguous row tiles
                ],
                out_specs=pl.BlockSpec((tn, P), lambda i: (i, 0)),
            ),
            compiler_params=pltpu.CompilerParams(
                dimension_semantics=("parallel",),             # megacore shard on v7x
                vmem_limit_bytes=int(vmem_limit),
            ),
            cost_estimate=cost,
        )(KT_f32, m_flat)

        return out_flat.reshape(sizem)

    return forward


if __name__ == "__main__":
    key = jax.random.PRNGKey(0)
    shape = (5, 5)                                   # conv-kernel shape, as in PDE-Net2
    m2k = make_m2k(shape)

    invMs = [jnp.asarray(A, dtype=jnp.float32) for A in _build_invM_np(shape)]

    # (batch, channels, H, W) grid of per-location moment tensors -> N = 2048 rows,
    # exercises the Pallas path with a 4-step grid of full tiles.
    m = jax.random.normal(key, (2, 4, 16, 16) + shape, dtype=jnp.float32)
    out = jax.block_until_ready(m2k(m))
    ref = jnp.einsum("ip,jq,...pq->...ij", invMs[0], invMs[1], m)
    assert out.shape == m.shape and out.dtype == m.dtype
    assert np.allclose(np.asarray(out), np.asarray(ref), rtol=1e-4, atol=1e-5)

    # Ragged N (1105 rows, not a multiple of the row tile) -> clipped last block.
    m3 = jax.random.normal(jax.random.PRNGKey(2), (5, 13, 17) + shape, dtype=jnp.float32)
    out3 = jax.block_until_ready(m2k(m3))
    ref3 = jnp.einsum("ip,jq,...pq->...ij", invMs[0], invMs[1], m3)
    assert out3.shape == m3.shape
    assert np.allclose(np.asarray(out3), np.asarray(ref3), rtol=1e-4, atol=1e-5)

    # m.dim() == self.dim() path (_packdim adds a leading axis) -> small-N fast path.
    m2 = jax.random.normal(jax.random.PRNGKey(1), shape, dtype=jnp.float32)
    out2 = jax.block_until_ready(m2k(m2))
    ref2 = jnp.einsum("ip,jq,pq->ij", invMs[0], invMs[1], m2)
    assert out2.shape == m2.shape
    assert np.allclose(np.asarray(out2), np.asarray(ref2), rtol=1e-4, atol=1e-5)

    print("KERNEL_OK")
</pallas_src>

<mosaic_0001>
module attributes {stable_mosaic.version = 11 : i64} {
  func.func @_m2k_kernel(%arg0: i32, %arg1: memref<25x25xf32, #tpu.memory_space<vmem>>, %arg2: memref<512x25xf32, #tpu.memory_space<vmem>>, %arg3: memref<512x25xf32, #tpu.memory_space<vmem>>) attributes {dimension_semantics = [#tpu.dimension_semantics<parallel>], iteration_bounds = array<i64: 4>, scalar_prefetch = 0 : i64, scratch_operands = 0 : i64, tpu.core_type = #tpu.core_type<tc>, window_params = [{pipeline_mode = #tpu.pipeline_mode<synchronous>, transform_indices = @transform_0, window_bounds = array<i64: 25, 25>}, {transform_indices = @transform_1, window_bounds = array<i64: 512, 25>}, {transform_indices = @transform_2, window_bounds = array<i64: 512, 25>}]} {
    %c0 = arith.constant 0 : index
    %c0_0 = arith.constant 0 : index
    %0 = vector.load %arg2[%c0, %c0_0] : memref<512x25xf32, #tpu.memory_space<vmem>>, vector<512x25xf32>
    %c0_1 = arith.constant 0 : index
    %c0_2 = arith.constant 0 : index
    %1 = vector.load %arg1[%c0_1, %c0_2] : memref<25x25xf32, #tpu.memory_space<vmem>>, vector<25x25xf32>
    %cst = arith.constant dense<0.000000e+00> : vector<512x25xf32>
    %2 = tpu.matmul %0, %1, %cst {dimension_numbers = #tpu.dot_dimension_numbers<[1], [0], [0], [1], [0, 0, 1, 1], [], []>} : vector<512x25xf32>, vector<25x25xf32>, vector<512x25xf32> -> vector<512x25xf32>
    %c0_3 = arith.constant 0 : index
    %c0_4 = arith.constant 0 : index
    %3 = vector.load %arg3[%c0_3, %c0_4] : memref<512x25xf32, #tpu.memory_space<vmem>>, vector<512x25xf32>
    tpu.vector_store %arg3[%c0_3, %c0_4], %2 {strides = array<i32>} : memref<512x25xf32, #tpu.memory_space<vmem>>, vector<512x25xf32>,
    return
  }
  func.func @transform_0(%arg0: i32) -> (i32, i32) {
    %c0_i32 = arith.constant 0 : i32
    %c0_i32_0 = arith.constant 0 : i32
    %c0_i32_1 = arith.constant 0 : i32
    return %c0_i32, %c0_i32_0 : i32, i32
  }
  func.func @transform_1(%arg0: i32) -> (i32, i32) {
    %c0_i32 = arith.constant 0 : i32
    %c0_i32_0 = arith.constant 0 : i32
    return %arg0, %c0_i32 : i32, i32
  }
  func.func @transform_2(%arg0: i32) -> (i32, i32) {
    %c0_i32 = arith.constant 0 : i32
    %c0_i32_0 = arith.constant 0 : i32
    return %arg0, %c0_i32 : i32, i32
  }
}

</mosaic_0001>

<bundles_post_ra>
// kernel: tpu_custom_call.1
= control target key start
LH: loop header
LB: loop body
LE: loop exit
PB: predicated region body
PF: predicated region fallthrough
CT: control target
= control target key end

     0   :  { %s860_s9 = smov 0   ;;  %s1156_s0 = inlined_call_operand.vmem [shape: f32[25,25], index: 0, kind: input, shape index: {}]   ;;  %s1157_s1 = inlined_call_operand.vmem [shape: f32[2048,25], index: 1, kind: input, shape index: {}]   ;;  %s1158_s2 = inlined_call_operand.vmem [shape: f32[2048,25], index: 2, kind: output, shape index: {}]  }
   0x1 LB: > { %s741_s10 = sadd.s32 4294967295, %s843_s9   ;;  %p745_p0 = scmp.ge.s32.totalorder %s843_s9, 1  ;;  %s843_s9 = sphi %s860_s9, %s12_s9  }
   0x2   : > { %p113_p1 = scmp.lt.s32.totalorder %s843_s9, 5 }
   0x4   : > { %p114_p2 = pnand %p745_p0, %p113_p1 }
   0x5   : > { %s746_s15 = sshll.u32 (!%p114_p2), %s741_s10, 6 }
   0x6   : > { %117 = sbr.rel (%p114_p2) target bundleno = 273 (0x111), region = 28  ;;  %p136_p3 = scmp.lt.s32.totalorder (!%p114_p2), %s746_s15, 255 }
   0xb   : > { %v214_v0 = vld [vmem:[%s1156_s0 + $0x18] sm:$0x1]  ;;  %vm408_vm0 = vcmask 1040384   ;;  %v213_v1 = vld [vmem:[%s1156_s0 + $0x10] sm:$0xff]  ;;  %v212_v2 = vld [vmem:[%s1156_s0 + $0x8] sm:$0xff]  ;;  %s1160_s15 = smov (!%p136_p3, %s746_s15), 255 }
   0xc   : > { %818 = vmatpush.msk.msra.mxu2 %vm408_vm0, %v214_v0  ;;  %819 = vmatpush.msk.msra.mxu3 %vm408_vm0, %v214_v0  ;;  %v211_v3 = vld [vmem:[%s1156_s0] sm:$0xff]  ;;  %s747_s20 = sshll.u32 %s1160_s15, 3  ;;  %vm215_vm1 = vcmask 203776  }
   0xd   : > { %750 = vmatpush.msk.msra.mxu0 %vm408_vm0, %v214_v0  ;;  %817 = vmatpush.msk.msra.mxu1 %vm408_vm0, %v214_v0  ;;  %s888_s23 = scalar_lea.vmem %s1157_s1, %s747_s20  ;;  %s1023_s26 = scalar_lea.vmem %s1158_s2, %s747_s20 }
   0xe   : > { %821 = vmatpush.msra.mxu2 %v213_v1  ;;  %822 = vmatpush.msra.mxu3 %v213_v1  ;;  %v179_v4 = vld [vmem:[%s888_s23 + $0x100] sm:$0xff]  ;;  %v180_v8 = vld [vmem:[%s888_s23 + $0x108] sm:$0xff]  ;;  %v181_v12 = vld [vmem:[%s888_s23 + $0x110] sm:$0xff] }
   0xf   : > { %425 = vmatpush.msra.mxu0 %v213_v1  ;;  %820 = vmatpush.msra.mxu1 %v213_v1  ;;  %v195_v5 = vld [vmem:[%s888_s23 + $0x180] sm:$0xff]  ;;  %v196_v9 = vld [vmem:[%s888_s23 + $0x188] sm:$0xff]  ;;  %v197_v13 = vld [vmem:[%s888_s23 + $0x190] sm:$0xff] }
  0x10   : > { %824 = vmatpush.msra.mxu2 %v212_v2  ;;  %825 = vmatpush.msra.mxu3 %v212_v2  ;;  %v147_v6 = vld [vmem:[%s888_s23] sm:$0xff]  ;;  %v148_v10 = vld [vmem:[%s888_s23 + $0x8] sm:$0xff]  ;;  %v149_v14 = vld [vmem:[%s888_s23 + $0x10] sm:$0xff] }
  0x11   : > { %426 = vmatpush.msra.mxu0 %v212_v2  ;;  %823 = vmatpush.msra.mxu1 %v212_v2  ;;  %v163_v7 = vld [vmem:[%s888_s23 + $0x80] sm:$0xff]  ;;  %v164_v11 = vld [vmem:[%s888_s23 + $0x88] sm:$0xff]  ;;  %v165_v15 = vld [vmem:[%s888_s23 + $0x90] sm:$0xff] }
  0x12   : > { %827 = vmatpush.msra.mxu2 %v211_v3  ;;  %828 = vmatpush.msra.mxu3 %v211_v3  ;;  %v182_v16 = vld [vmem:[%s888_s23 + $0x118] sm:$0xff]  ;;  %v183_v20 = vld [vmem:[%s888_s23 + $0x120] sm:$0xff]  ;;  %v184_v24 = vld [vmem:[%s888_s23 + $0x128] sm:$0xff] }
  0x13   : > { %783 = vmatmul.msk.f32.vlgmr.msra.gmra.mxu2 %vm215_vm1, %v179_v4  ;;  %799 = vmatmul.msk.f32.vlgmr.msra.gmra.mxu3 %vm215_vm1, %v195_v5  ;;  %v198_v17 = vld [vmem:[%s888_s23 + $0x198] sm:$0xff]  ;;  %v199_v21 = vld [vmem:[%s888_s23 + $0x1a0] sm:$0xff]  ;;  %v200_v25 = vld [vmem:[%s888_s23 + $0x1a8] sm:$0xff] }
  0x14   : > { %427 = vmatpush.msra.mxu0 %v211_v3  ;;  %826 = vmatpush.msra.mxu1 %v211_v3  ;;  %v150_v18 = vld [vmem:[%s888_s23 + $0x18] sm:$0xff]  ;;  %v151_v22 = vld [vmem:[%s888_s23 + $0x20] sm:$0xff]  ;;  %v152_v26 = vld [vmem:[%s888_s23 + $0x28] sm:$0xff] }
  0x15   : > { %751 = vmatmul.msk.f32.vlgmr.msra.gmra.mxu0 %vm215_vm1, %v147_v6  ;;  %767 = vmatmul.msk.f32.vlgmr.msra.gmra.mxu1 %vm215_vm1, %v163_v7  ;;  %v166_v19 = vld [vmem:[%s888_s23 + $0x98] sm:$0xff]  ;;  %v167_v23 = vld [vmem:[%s888_s23 + $0xa0] sm:$0xff]  ;;  %v168_v27 = vld [vmem:[%s888_s23 + $0xa8] sm:$0xff] }
  0x16   : > { %v185_v28 = vld [vmem:[%s888_s23 + $0x130] sm:$0xff]  ;;  %v186_v32 = vld [vmem:[%s888_s23 + $0x138] sm:$0xff]  ;;  %v187_v36 = vld [vmem:[%s888_s23 + $0x140] sm:$0xff] }
  0x17   : > { %v201_v29 = vld [vmem:[%s888_s23 + $0x1b0] sm:$0xff]  ;;  %v202_v33 = vld [vmem:[%s888_s23 + $0x1b8] sm:$0xff]  ;;  %v203_v37 = vld [vmem:[%s888_s23 + $0x1c0] sm:$0xff] }
  0x18   : > { %v153_v30 = vld [vmem:[%s888_s23 + $0x30] sm:$0xff]  ;;  %v154_v34 = vld [vmem:[%s888_s23 + $0x38] sm:$0xff]  ;;  %v155_v38 = vld [vmem:[%s888_s23 + $0x40] sm:$0xff] }
  0x19   : > { %v169_v31 = vld [vmem:[%s888_s23 + $0xb0] sm:$0xff]  ;;  %v170_v35 = vld [vmem:[%s888_s23 + $0xb8] sm:$0xff]  ;;  %v171_v39 = vld [vmem:[%s888_s23 + $0xc0] sm:$0xff] }
  0x1a   : > { %v188_v40 = vld [vmem:[%s888_s23 + $0x148] sm:$0xff]  ;;  %v189_v44 = vld [vmem:[%s888_s23 + $0x150] sm:$0xff]  ;;  %v190_v48 = vld [vmem:[%s888_s23 + $0x158] sm:$0xff] }
  0x1b   : > { %784 = vmatmul.msk.f32.gmra.mxu2 %vm215_vm1, %v180_v8  ;;  %800 = vmatmul.msk.f32.gmra.mxu3 %vm215_vm1, %v196_v9  ;;  %v204_v41 = vld [vmem:[%s888_s23 + $0x1c8] sm:$0xff]  ;;  %v205_v45 = vld [vmem:[%s888_s23 + $0x1d0] sm:$0xff]  ;;  %v206_v49 = vld [vmem:[%s888_s23 + $0x1d8] sm:$0xff] }
  0x1c   : > { %v156_v42 = vld [vmem:[%s888_s23 + $0x48] sm:$0xff]  ;;  %v157_v46 = vld [vmem:[%s888_s23 + $0x50] sm:$0xff]  ;;  %v158_v50 = vld [vmem:[%s888_s23 + $0x58] sm:$0xff] }
  0x1d   : > { %752 = vmatmul.msk.f32.gmra.mxu0 %vm215_vm1, %v148_v10  ;;  %768 = vmatmul.msk.f32.gmra.mxu1 %vm215_vm1, %v164_v11  ;;  %v172_v43 = vld [vmem:[%s888_s23 + $0xc8] sm:$0xff]  ;;  %v173_v47 = vld [vmem:[%s888_s23 + $0xd0] sm:$0xff]  ;;  %v174_v51 = vld [vmem:[%s888_s23 + $0xd8] sm:$0xff] }
  0x1e   : > { %v191_v52 = vld [vmem:[%s888_s23 + $0x160] sm:$0xff]  ;;  %v192_v56 = vld [vmem:[%s888_s23 + $0x168] sm:$0xff]  ;;  %v193_v60 = vld [vmem:[%s888_s23 + $0x170] sm:$0xff] }
  0x1f   : > { %v207_v53 = vld [vmem:[%s888_s23 + $0x1e0] sm:$0xff]  ;;  %v208_v57 = vld [vmem:[%s888_s23 + $0x1e8] sm:$0xff]  ;;  %v209_v61 = vld [vmem:[%s888_s23 + $0x1f0] sm:$0xff] }
  0x20   : > { %v159_v54 = vld [vmem:[%s888_s23 + $0x60] sm:$0xff]  ;;  %v160_v58 = vld [vmem:[%s888_s23 + $0x68] sm:$0xff]  ;;  %v161_v62 = vld [vmem:[%s888_s23 + $0x70] sm:$0xff] }
  0x21   : > { %v175_v55 = vld [vmem:[%s888_s23 + $0xe0] sm:$0xff]  ;;  %v176_v59 = vld [vmem:[%s888_s23 + $0xe8] sm:$0xff]  ;;  %v177_v63 = vld [vmem:[%s888_s23 + $0xf0] sm:$0xff] }
  0x22   : > { %v194_v0 = vld [vmem:[%s888_s23 + $0x178] sm:$0xff] }
  0x23   : > { %785 = vmatmul.msk.f32.gmra.mxu2 %vm215_vm1, %v181_v12  ;;  %801 = vmatmul.msk.f32.gmra.mxu3 %vm215_vm1, %v197_v13  ;;  %v210_v1 = vld [vmem:[%s888_s23 + $0x1f8] sm:$0xff] }
  0x24   : > { %v162_v2 = vld [vmem:[%s888_s23 + $0x78] sm:$0xff] }
  0x25   : > { %753 = vmatmul.msk.f32.gmra.mxu0 %vm215_vm1, %v149_v14  ;;  %769 = vmatmul.msk.f32.gmra.mxu1 %vm215_vm1, %v165_v15  ;;  %v178_v3 = vld [vmem:[%s888_s23 + $0xf8] sm:$0xff] }
  0x2b   : > { %786 = vmatmul.msk.f32.gmra.mxu2 %vm215_vm1, %v182_v16  ;;  %802 = vmatmul.msk.f32.gmra.mxu3 %vm215_vm1, %v198_v17 }
  0x2d   : > { %754 = vmatmul.msk.f32.gmra.mxu0 %vm215_vm1, %v150_v18  ;;  %770 = vmatmul.msk.f32.gmra.mxu1 %vm215_vm1, %v166_v19 }
  0x33   : > { %787 = vmatmul.msk.f32.gmra.mxu2 %vm215_vm1, %v183_v20  ;;  %803 = vmatmul.msk.f32.gmra.mxu3 %vm215_vm1, %v199_v21 }
  0x35   : > { %755 = vmatmul.msk.f32.gmra.mxu0 %vm215_vm1, %v151_v22  ;;  %771 = vmatmul.msk.f32.gmra.mxu1 %vm215_vm1, %v167_v23 }
  0x3b   : > { %788 = vmatmul.msk.f32.gmra.mxu2 %vm215_vm1, %v184_v24  ;;  %804 = vmatmul.msk.f32.gmra.mxu3 %vm215_vm1, %v200_v25 }
  0x3d   : > { %756 = vmatmul.msk.f32.gmra.mxu0 %vm215_vm1, %v152_v26  ;;  %772 = vmatmul.msk.f32.gmra.mxu1 %vm215_vm1, %v168_v27 }
  0x43   : > { %789 = vmatmul.msk.f32.gmra.mxu2 %vm215_vm1, %v185_v28  ;;  %805 = vmatmul.msk.f32.gmra.mxu3 %vm215_vm1, %v201_v29 }
  0x45   : > { %757 = vmatmul.msk.f32.gmra.mxu0 %vm215_vm1, %v153_v30  ;;  %773 = vmatmul.msk.f32.gmra.mxu1 %vm215_vm1, %v169_v31 }
  0x4b   : > { %790 = vmatmul.msk.f32.gmra.mxu2 %vm215_vm1, %v186_v32  ;;  %806 = vmatmul.msk.f32.gmra.mxu3 %vm215_vm1, %v202_v33 }
  0x4d   : > { %758 = vmatmul.msk.f32.gmra.mxu0 %vm215_vm1, %v154_v34  ;;  %774 = vmatmul.msk.f32.gmra.mxu1 %vm215_vm1, %v170_v35 }
  0x53   : > { %791 = vmatmul.msk.f32.gmra.mxu2 %vm215_vm1, %v187_v36  ;;  %807 = vmatmul.msk.f32.gmra.mxu3 %vm215_vm1, %v203_v37 }
  0x55   : > { %759 = vmatmul.msk.f32.gmra.mxu0 %vm215_vm1, %v155_v38  ;;  %775 = vmatmul.msk.f32.gmra.mxu1 %vm215_vm1, %v171_v39 }
  0x5b   : > { %792 = vmatmul.msk.f32.gmra.mxu2 %vm215_vm1, %v188_v40  ;;  %808 = vmatmul.msk.f32.gmra.mxu3 %vm215_vm1, %v204_v41 }
  0x5d   : > { %760 = vmatmul.msk.f32.gmra.mxu0 %vm215_vm1, %v156_v42  ;;  %776 = vmatmul.msk.f32.gmra.mxu1 %vm215_vm1, %v172_v43 }
  0x63   : > { %793 = vmatmul.msk.f32.gmra.mxu2 %vm215_vm1, %v189_v44  ;;  %809 = vmatmul.msk.f32.gmra.mxu3 %vm215_vm1, %v205_v45 }
  0x65   : > { %761 = vmatmul.msk.f32.gmra.mxu0 %vm215_vm1, %v157_v46  ;;  %777 = vmatmul.msk.f32.gmra.mxu1 %vm215_vm1, %v173_v47 }
  0x6b   : > { %794 = vmatmul.msk.f32.gmra.mxu2 %vm215_vm1, %v190_v48  ;;  %810 = vmatmul.msk.f32.gmra.mxu3 %vm215_vm1, %v206_v49 }
  0x6d   : > { %762 = vmatmul.msk.f32.gmra.mxu0 %vm215_vm1, %v158_v50  ;;  %778 = vmatmul.msk.f32.gmra.mxu1 %vm215_vm1, %v174_v51 }
  0x73   : > { %795 = vmatmul.msk.f32.gmra.mxu2 %vm215_vm1, %v191_v52  ;;  %811 = vmatmul.msk.f32.gmra.mxu3 %vm215_vm1, %v207_v53 }
  0x75   : > { %763 = vmatmul.msk.f32.gmra.mxu0 %vm215_vm1, %v159_v54  ;;  %779 = vmatmul.msk.f32.gmra.mxu1 %vm215_vm1, %v175_v55 }
  0x7b   : > { %796 = vmatmul.msk.f32.gmra.mxu2 %vm215_vm1, %v192_v56  ;;  %812 = vmatmul.msk.f32.gmra.mxu3 %vm215_vm1, %v208_v57 }
  0x7d   : > { %764 = vmatmul.msk.f32.gmra.mxu0 %vm215_vm1, %v160_v58  ;;  %780 = vmatmul.msk.f32.gmra.mxu1 %vm215_vm1, %v176_v59 }
  0x83   : > { %797 = vmatmul.msk.f32.gmra.mxu2 %vm215_vm1, %v193_v60  ;;  %813 = vmatmul.msk.f32.gmra.mxu3 %vm215_vm1, %v209_v61 }
  0x85   : > { %765 = vmatmul.msk.f32.gmra.mxu0 %vm215_vm1, %v161_v62  ;;  %781 = vmatmul.msk.f32.gmra.mxu1 %vm215_vm1, %v177_v63 }
  0x8b   : > { %798 = vmatmul.msk.f32.gmra.mxu2 %vm215_vm1, %v194_v0  ;;  %814 = vmatmul.msk.f32.gmra.mxu3 %vm215_vm1, %v210_v1 }
  0x8d   : > { %766 = vmatmul.msk.f32.gmra.mxu0 %vm215_vm1, %v162_v2  ;;  %782 = vmatmul.msk.f32.gmra.mxu1 %vm215_vm1, %v178_v3 }
  0x92   : > { %v429_v4 = vpop.f32.mrf.mxu0  ;;  %v477_v5 = vpop.f32.mrf.mxu1 }
  0x93   : > { %621 = vst.msk [vmem:[%s1023_s26] sm:$0xff] %vm215_vm1, %v429_v4 }
  0x94   : > { %637 = vst.msk [vmem:[%s1023_s26 + $0x80] sm:$0xff] %vm215_vm1, %v477_v5 }
  0x96   : > { %v525_v6 = vpop.f32.mrf.mxu2  ;;  %v573_v7 = vpop.f32.mrf.mxu3 }
  0x97   : > { %653 = vst.msk [vmem:[%s1023_s26 + $0x100] sm:$0xff] %vm215_vm1, %v525_v6 }
  0x98   : > { %669 = vst.msk [vmem:[%s1023_s26 + $0x180] sm:$0xff] %vm215_vm1, %v573_v7 }
  0x9a   : > { %v432_v8 = vpop.f32.mrf.mxu0  ;;  %v480_v9 = vpop.f32.mrf.mxu1 }
  0x9b   : > { %622 = vst.msk [vmem:[%s1023_s26 + $0x8] sm:$0xff] %vm215_vm1, %v432_v8 }
  0x9c   : > { %638 = vst.msk [vmem:[%s1023_s26 + $0x88] sm:$0xff] %vm215_vm1, %v480_v9 }
  0x9e   : > { %v528_v10 = vpop.f32.mrf.mxu2  ;;  %v576_v11 = vpop.f32.mrf.mxu3 }
  0x9f   : > { %654 = vst.msk [vmem:[%s1023_s26 + $0x108] sm:$0xff] %vm215_vm1, %v528_v10 }
  0xa0   : > { %670 = vst.msk [vmem:[%s1023_s26 + $0x188] sm:$0xff] %vm215_vm1, %v576_v11 }
  0xa2   : > { %v435_v12 = vpop.f32.mrf.mxu0  ;;  %v483_v13 = vpop.f32.mrf.mxu1 }
  0xa3   : > { %623 = vst.msk [vmem:[%s1023_s26 + $0x10] sm:$0xff] %vm215_vm1, %v435_v12 }
  0xa4   : > { %639 = vst.msk [vmem:[%s1023_s26 + $0x90] sm:$0xff] %vm215_vm1, %v483_v13 }
  0xa6   : > { %v531_v14 = vpop.f32.mrf.mxu2  ;;  %v579_v15 = vpop.f32.mrf.mxu3 }
  0xa7   : > { %655 = vst.msk [vmem:[%s1023_s26 + $0x110] sm:$0xff] %vm215_vm1, %v531_v14 }
  0xa8   : > { %671 = vst.msk [vmem:[%s1023_s26 + $0x190] sm:$0xff] %vm215_vm1, %v579_v15 }
  0xaa   : > { %v438_v16 = vpop.f32.mrf.mxu0  ;;  %v486_v17 = vpop.f32.mrf.mxu1 }
  0xab   : > { %624 = vst.msk [vmem:[%s1023_s26 + $0x18] sm:$0xff] %vm215_vm1, %v438_v16 }
  0xac   : > { %640 = vst.msk [vmem:[%s1023_s26 + $0x98] sm:$0xff] %vm215_vm1, %v486_v17 }
  0xae   : > { %v534_v18 = vpop.f32.mrf.mxu2  ;;  %v582_v19 = vpop.f32.mrf.mxu3 }
  0xaf   : > { %656 = vst.msk [vmem:[%s1023_s26 + $0x118] sm:$0xff] %vm215_vm1, %v534_v18 }
  0xb0   : > { %672 = vst.msk [vmem:[%s1023_s26 + $0x198] sm:$0xff] %vm215_vm1, %v582_v19 }
  0xb2   : > { %v441_v20 = vpop.f32.mrf.mxu0  ;;  %v489_v21 = vpop.f32.mrf.mxu1 }
  0xb3   : > { %625 = vst.msk [vmem:[%s1023_s26 + $0x20] sm:$0xff] %vm215_vm1, %v441_v20 }
  0xb4   : > { %641 = vst.msk [vmem:[%s1023_s26 + $0xa0] sm:$0xff] %vm215_vm1, %v489_v21 }
  0xb6   : > { %v537_v22 = vpop.f32.mrf.mxu2  ;;  %v585_v23 = vpop.f32.mrf.mxu3 }
  0xb7   : > { %657 = vst.msk [vmem:[%s1023_s26 + $0x120] sm:$0xff] %vm215_vm1, %v537_v22 }
  0xb8   : > { %673 = vst.msk [vmem:[%s1023_s26 + $0x1a0] sm:$0xff] %vm215_vm1, %v585_v23 }
  0xba   : > { %v444_v24 = vpop.f32.mrf.mxu0  ;;  %v492_v25 = vpop.f32.mrf.mxu1 }
  0xbb   : > { %626 = vst.msk [vmem:[%s1023_s26 + $0x28] sm:$0xff] %vm215_vm1, %v444_v24 }
  0xbc   : > { %642 = vst.msk [vmem:[%s1023_s26 + $0xa8] sm:$0xff] %vm215_vm1, %v492_v25 }
  0xbe   : > { %v540_v26 = vpop.f32.mrf.mxu2  ;;  %v588_v27 = vpop.f32.mrf.mxu3 }
  0xbf   : > { %658 = vst.msk [vmem:[%s1023_s26 + $0x128] sm:$0xff] %vm215_vm1, %v540_v26 }
  0xc0   : > { %674 = vst.msk [vmem:[%s1023_s26 + $0x1a8] sm:$0xff] %vm215_vm1, %v588_v27 }
  0xc2   : > { %v447_v28 = vpop.f32.mrf.mxu0  ;;  %v495_v29 = vpop.f32.mrf.mxu1 }
  0xc3   : > { %627 = vst.msk [vmem:[%s1023_s26 + $0x30] sm:$0xff] %vm215_vm1, %v447_v28 }
  0xc4   : > { %643 = vst.msk [vmem:[%s1023_s26 + $0xb0] sm:$0xff] %vm215_vm1, %v495_v29 }
  0xc6   : > { %v543_v30 = vpop.f32.mrf.mxu2  ;;  %v591_v31 = vpop.f32.mrf.mxu3 }
  0xc7   : > { %659 = vst.msk [vmem:[%s1023_s26 + $0x130] sm:$0xff] %vm215_vm1, %v543_v30 }
  0xc8   : > { %675 = vst.msk [vmem:[%s1023_s26 + $0x1b0] sm:$0xff] %vm215_vm1, %v591_v31 }
  0xca   : > { %v450_v32 = vpop.f32.mrf.mxu0  ;;  %v498_v33 = vpop.f32.mrf.mxu1 }
  0xcb   : > { %628 = vst.msk [vmem:[%s1023_s26 + $0x38] sm:$0xff] %vm215_vm1, %v450_v32 }
  0xcc   : > { %644 = vst.msk [vmem:[%s1023_s26 + $0xb8] sm:$0xff] %vm215_vm1, %v498_v33 }
  0xce   : > { %v546_v34 = vpop.f32.mrf.mxu2  ;;  %v594_v35 = vpop.f32.mrf.mxu3 }
  0xcf   : > { %660 = vst.msk [vmem:[%s1023_s26 + $0x138] sm:$0xff] %vm215_vm1, %v546_v34 }
  0xd0   : > { %676 = vst.msk [vmem:[%s1023_s26 + $0x1b8] sm:$0xff] %vm215_vm1, %v594_v35 }
  0xd2   : > { %v453_v36 = vpop.f32.mrf.mxu0  ;;  %v501_v37 = vpop.f32.mrf.mxu1 }
  0xd3   : > { %629 = vst.msk [vmem:[%s1023_s26 + $0x40] sm:$0xff] %vm215_vm1, %v453_v36 }
  0xd4   : > { %645 = vst.msk [vmem:[%s1023_s26 + $0xc0] sm:$0xff] %vm215_vm1, %v501_v37 }
  0xd6   : > { %v549_v38 = vpop.f32.mrf.mxu2  ;;  %v597_v39 = vpop.f32.mrf.mxu3 }
  0xd7   : > { %661 = vst.msk [vmem:[%s1023_s26 + $0x140] sm:$0xff] %vm215_vm1, %v549_v38 }
  0xd8   : > { %677 = vst.msk [vmem:[%s1023_s26 + $0x1c0] sm:$0xff] %vm215_vm1, %v597_v39 }
  0xda   : > { %v456_v40 = vpop.f32.mrf.mxu0  ;;  %v504_v41 = vpop.f32.mrf.mxu1 }
  0xdb   : > { %630 = vst.msk [vmem:[%s1023_s26 + $0x48] sm:$0xff] %vm215_vm1, %v456_v40 }
  0xdc   : > { %646 = vst.msk [vmem:[%s1023_s26 + $0xc8] sm:$0xff] %vm215_vm1, %v504_v41 }
  0xde   : > { %v552_v42 = vpop.f32.mrf.mxu2  ;;  %v600_v43 = vpop.f32.mrf.mxu3 }
  0xdf   : > { %662 = vst.msk [vmem:[%s1023_s26 + $0x148] sm:$0xff] %vm215_vm1, %v552_v42 }
  0xe0   : > { %678 = vst.msk [vmem:[%s1023_s26 + $0x1c8] sm:$0xff] %vm215_vm1, %v600_v43 }
  0xe2   : > { %v459_v44 = vpop.f32.mrf.mxu0  ;;  %v507_v45 = vpop.f32.mrf.mxu1 }
  0xe3   : > { %631 = vst.msk [vmem:[%s1023_s26 + $0x50] sm:$0xff] %vm215_vm1, %v459_v44 }
  0xe4   : > { %647 = vst.msk [vmem:[%s1023_s26 + $0xd0] sm:$0xff] %vm215_vm1, %v507_v45 }
  0xe6   : > { %v555_v46 = vpop.f32.mrf.mxu2  ;;  %v603_v47 = vpop.f32.mrf.mxu3 }
  0xe7   : > { %663 = vst.msk [vmem:[%s1023_s26 + $0x150] sm:$0xff] %vm215_vm1, %v555_v46 }
  0xe8   : > { %679 = vst.msk [vmem:[%s1023_s26 + $0x1d0] sm:$0xff] %vm215_vm1, %v603_v47 }
  0xea   : > { %v462_v48 = vpop.f32.mrf.mxu0  ;;  %v510_v49 = vpop.f32.mrf.mxu1 }
  0xeb   : > { %632 = vst.msk [vmem:[%s1023_s26 + $0x58] sm:$0xff] %vm215_vm1, %v462_v48 }
  0xec   : > { %648 = vst.msk [vmem:[%s1023_s26 + $0xd8] sm:$0xff] %vm215_vm1, %v510_v49 }
  0xee   : > { %v558_v50 = vpop.f32.mrf.mxu2  ;;  %v606_v51 = vpop.f32.mrf.mxu3 }
  0xef   : > { %664 = vst.msk [vmem:[%s1023_s26 + $0x158] sm:$0xff] %vm215_vm1, %v558_v50 }
  0xf0   : > { %680 = vst.msk [vmem:[%s1023_s26 + $0x1d8] sm:$0xff] %vm215_vm1, %v606_v51 }
  0xf2   : > { %v465_v52 = vpop.f32.mrf.mxu0  ;;  %v513_v53 = vpop.f32.mrf.mxu1 }
  0xf3   : > { %633 = vst.msk [vmem:[%s1023_s26 + $0x60] sm:$0xff] %vm215_vm1, %v465_v52 }
  0xf4   : > { %649 = vst.msk [vmem:[%s1023_s26 + $0xe0] sm:$0xff] %vm215_vm1, %v513_v53 }
  0xf6   : > { %v561_v54 = vpop.f32.mrf.mxu2  ;;  %v609_v55 = vpop.f32.mrf.mxu3 }
  0xf7   : > { %665 = vst.msk [vmem:[%s1023_s26 + $0x160] sm:$0xff] %vm215_vm1, %v561_v54 }
  0xf8   : > { %681 = vst.msk [vmem:[%s1023_s26 + $0x1e0] sm:$0xff] %vm215_vm1, %v609_v55 }
  0xfa   : > { %v468_v56 = vpop.f32.mrf.mxu0  ;;  %v516_v57 = vpop.f32.mrf.mxu1 }
  0xfb   : > { %634 = vst.msk [vmem:[%s1023_s26 + $0x68] sm:$0xff] %vm215_vm1, %v468_v56 }
  0xfc   : > { %650 = vst.msk [vmem:[%s1023_s26 + $0xe8] sm:$0xff] %vm215_vm1, %v516_v57 }
  0xfe   : > { %v564_v58 = vpop.f32.mrf.mxu2  ;;  %v612_v59 = vpop.f32.mrf.mxu3 }
  0xff   : > { %666 = vst.msk [vmem:[%s1023_s26 + $0x168] sm:$0xff] %vm215_vm1, %v564_v58 }
 0x100   : > { %682 = vst.msk [vmem:[%s1023_s26 + $0x1e8] sm:$0xff] %vm215_vm1, %v612_v59 }
 0x102   : > { %v471_v60 = vpop.f32.mrf.mxu0  ;;  %v519_v61 = vpop.f32.mrf.mxu1 }
 0x103   : > { %635 = vst.msk [vmem:[%s1023_s26 + $0x70] sm:$0xff] %vm215_vm1, %v471_v60 }
 0x104   : > { %651 = vst.msk [vmem:[%s1023_s26 + $0xf0] sm:$0xff] %vm215_vm1, %v519_v61 }
 0x106   : > { %v567_v62 = vpop.f32.mrf.mxu2  ;;  %v615_v63 = vpop.f32.mrf.mxu3 }
 0x107   : > { %667 = vst.msk [vmem:[%s1023_s26 + $0x170] sm:$0xff] %vm215_vm1, %v567_v62 }
 0x108   : > { %683 = vst.msk [vmem:[%s1023_s26 + $0x1f0] sm:$0xff] %vm215_vm1, %v615_v63 }
 0x10a   : > { %v474_v0 = vpop.f32.mrf.mxu0  ;;  %v522_v1 = vpop.f32.mrf.mxu1 }
 0x10b   : > { %636 = vst.msk [vmem:[%s1023_s26 + $0x78] sm:$0xff] %vm215_vm1, %v474_v0 }
 0x10c   : > { %652 = vst.msk [vmem:[%s1023_s26 + $0xf8] sm:$0xff] %vm215_vm1, %v522_v1 }
 0x10e   : > { %v570_v2 = vpop.f32.mrf.mxu2  ;;  %v618_v3 = vpop.f32.mrf.mxu3 }
 0x10f   : > { %668 = vst.msk [vmem:[%s1023_s26 + $0x178] sm:$0xff] %vm215_vm1, %v570_v2 }
 0x110   : > { %684 = vst.msk [vmem:[%s1023_s26 + $0x1f8] sm:$0xff] %vm215_vm1, %v618_v3 }
 0x111 PF: > { %s12_s9 = sadd.s32 1, %s843_s9  }
 0x112   : > { %p9_p4 = scmp.ge.s32.totalorder %s12_s9, 6  }
 0x114   :  { %11 = sbr.rel (!%p9_p4) target bundleno = 1 (0x1), region = 58 }

</bundles_post_ra>
